<compile_context>
chip_gen: v7x
topology: tpu7x:2x2x1
jax: 0.10.0
libtpu: 0.0.40
codegen_flags: <defaults>
</compile_context>

<pallas_src>
import numpy as np
import jax
import jax.numpy as jnp
from jax.experimental import pallas as pl
from jax.experimental.pallas import tpu as pltpu

BN_EPS = 1e-5


# ----------------------------------------------------------------------------
# Pass 1: conv (3 block-Toeplitz matmuls) + per-tile sum / sum-of-squares.
# ----------------------------------------------------------------------------
def _conv_stats_kernel(x_ref, t_ref, conv_ref, stats_ref, xpad):
    # x_ref    : (1, H, W*Cin)      one image; NHWC bytes viewed as a 2-D slab
    # t_ref    : (3, W*Cin, W*Cout) block-Toeplitz weights (one per kh tap)
    # conv_ref : (1, H, W*Cout)     conv output (bias omitted -- cancels in BN)
    # stats_ref: (1, 2, W*Cout)     per-tile [sum ; sum of squares] over rows
    # xpad     : (H+2, W*Cin)       VMEM scratch: zero top/bottom halo rows
    H = x_ref.shape[1]
    wcin = x_ref.shape[2]

    # Build the height halo in VMEM.  Halo rows are zeroed unconditionally
    # (scratch is per-core and uninitialized; do NOT gate this on program_id).
    xpad[0:1, :] = jnp.zeros((1, wcin), jnp.float32)
    xpad[H + 1:H + 2, :] = jnp.zeros((1, wcin), jnp.float32)
    xpad[1:H + 1, :] = x_ref[0]

    # One dense K = W*Cin matmul per kernel row; kw taps and the width
    # zero-padding are folded into the Toeplitz weights.
    acc = jnp.dot(xpad[0:H, :], t_ref[0], preferred_element_type=jnp.float32)
    acc = acc + jnp.dot(xpad[1:H + 1, :], t_ref[1],
                        preferred_element_type=jnp.float32)
    acc = acc + jnp.dot(xpad[2:H + 2, :], t_ref[2],
                        preferred_element_type=jnp.float32)

    conv_ref[0] = acc                                        # lane-dense store
    s1 = jnp.sum(acc, axis=0, keepdims=True)                 # (1, W*Cout)
    s2 = jnp.sum(acc * acc, axis=0, keepdims=True)           # (1, W*Cout)
    stats_ref[0] = jnp.concatenate([s1, s2], axis=0)


# ----------------------------------------------------------------------------
# Pass 2: fused scale/shift (conv bias + BN folded) + ReLU, single lane-dense
# elementwise pass.  Output aliases the conv buffer (written in place).
# ----------------------------------------------------------------------------
def _bn_relu_kernel(conv_ref, ss_ref, out_ref):
    # conv_ref : (1, H, W*Cout)   out_ref aliases the same HBM buffer
    # ss_ref   : (2, W*Cout)      row 0 = scale, row 1 = shift (per column)
    y = conv_ref[0] * ss_ref[0:1, :] + ss_ref[1:2, :]
    out_ref[0] = jnp.maximum(y, 0.0)


def _toeplitz_weights(w_hwio, W):
    """(3,3,Cin,Cout) HWIO weights -> (3, W*Cin, W*Cout) block-Toeplitz.

    t[kh, (w+kw-1)*Cin + c, w*Cout + o] = w_hwio[kh, kw, c, o]; entries whose
    input column (w+kw-1) falls outside [0, W) stay zero, which implements the
    width zero-padding inside the contraction.
    """
    _, _, cin, cout = w_hwio.shape
    kwv, wv = np.meshgrid(np.arange(3), np.arange(W), indexing="ij")   # (3, W)
    valid = (wv + kwv - 1 >= 0) & (wv + kwv - 1 < W)
    kw_l = kwv[valid]                                                  # (P,)
    w_l = wv[valid]                                                    # (P,)
    rows = ((w_l + kw_l - 1) * cin)[:, None, None] + np.arange(cin)[None, :, None]
    cols = (w_l * cout)[:, None, None] + np.arange(cout)[None, None, :]
    vals = w_hwio[:, kw_l, :, :]                                       # (3,P,Cin,Cout)
    t = jnp.zeros((3, W * cin, W * cout), jnp.float32)
    return t.at[:, rows, cols].set(vals)


@jax.jit
def one_conv(x_nchw, w_hwio, bias, gamma, beta):
    """Conv2d(3x3,s1,p1) -> BatchNorm2d(training batch stats) -> ReLU.

    x_nchw: (N, Cin, H, W) f32.  Returns (N, Cout, H, W) f32.
    """
    N, Cin, H, W = x_nchw.shape
    Cout = w_hwio.shape[-1]
    wcin, wcout = W * Cin, W * Cout

    # NCHW -> NHWC, then view each image as a (H, W*Cin) 2-D slab (free reshape).
    # TODO(synk): keep the surrounding model NHWC end-to-end to drop this
    # boundary transpose (and the one on the output).
    x2d = jnp.transpose(x_nchw, (0, 2, 3, 1)).reshape(N, H, wcin)

    t = _toeplitz_weights(w_hwio, W)

    cparams = pltpu.CompilerParams(
        dimension_semantics=("parallel",),           # batch tiles -> 2 TCs on v7x
        vmem_limit_bytes=32 * 1024 * 1024)           # explicit; fits v7x VMEM

    conv2d, stats = pl.pallas_call(
        _conv_stats_kernel,
        out_shape=(jax.ShapeDtypeStruct((N, H, wcout), jnp.float32),
                   jax.ShapeDtypeStruct((N, 2, wcout), jnp.float32)),
        grid=(N,),
        in_specs=[pl.BlockSpec((1, H, wcin), lambda n: (n, 0, 0)),
                  pl.BlockSpec((3, wcin, wcout), lambda n: (0, 0, 0))],
        out_specs=(pl.BlockSpec((1, H, wcout), lambda n: (n, 0, 0)),
                   pl.BlockSpec((1, 2, wcout), lambda n: (n, 0, 0))),
        scratch_shapes=[pltpu.VMEM((H + 2, wcin), jnp.float32)],
        compiler_params=cparams,
    )(x2d, t)

    # Global batch statistics from the per-tile partials (tiny reduction),
    # then fold everything into one per-channel scale/shift.
    count = jnp.float32(N * H * W)
    ssum = stats[:, 0, :].reshape(N, W, Cout).sum(axis=(0, 1))
    ssq = stats[:, 1, :].reshape(N, W, Cout).sum(axis=(0, 1))
    mean = ssum / count
    var = ssq / count - mean * mean                  # biased (training) variance
    scale = gamma * jax.lax.rsqrt(var + BN_EPS)
    # Training-mode BN subtracts the batch mean, so the conv bias cancels
    # exactly: y = (conv + b - (mean_conv + b)) * scale + beta.
    _ = bias
    shift = beta - mean * scale
    # Pack scale/shift into one lane-dense (2, W*Cout) operand for pass 2.
    ss = jnp.stack([jnp.tile(scale, W), jnp.tile(shift, W)], axis=0)

    out2d = pl.pallas_call(
        _bn_relu_kernel,
        out_shape=jax.ShapeDtypeStruct((N, H, wcout), jnp.float32),
        grid=(N,),
        in_specs=[pl.BlockSpec((1, H, wcout), lambda n: (n, 0, 0)),
                  pl.BlockSpec((2, wcout), lambda n: (0, 0))],
        out_specs=pl.BlockSpec((1, H, wcout), lambda n: (n, 0, 0)),
        input_output_aliases={0: 0},                 # write ReLU over conv buffer
        compiler_params=cparams,
    )(conv2d, ss)

    out_nhwc = out2d.reshape(N, H, W, Cout)
    return jnp.transpose(out_nhwc, (0, 3, 1, 2))     # NHWC -> NCHW


def one_conv_ref(x_nchw, w_hwio, bias, gamma, beta):
    """Pure-JAX reference (same semantics) for validation."""
    w_oihw = jnp.transpose(w_hwio, (3, 2, 0, 1))
    conv = jax.lax.conv_general_dilated(
        x_nchw, w_oihw, window_strides=(1, 1), padding=((1, 1), (1, 1)),
        dimension_numbers=("NCHW", "OIHW", "NCHW"))
    conv = conv + bias[None, :, None, None]
    mean = jnp.mean(conv, axis=(0, 2, 3), keepdims=True)
    var = jnp.mean((conv - mean) ** 2, axis=(0, 2, 3), keepdims=True)
    y = (conv - mean) * jax.lax.rsqrt(var + BN_EPS)
    y = y * gamma[None, :, None, None] + beta[None, :, None, None]
    return jnp.maximum(y, 0.0)


if __name__ == "__main__":
    # Small shapes consistent with the module: N=2, Cin=8, Cout=16, 16x16 spatial.
    N, Cin, Cout, H, W = 2, 8, 16, 16, 16

    key = jax.random.PRNGKey(0)
    k_x, k_w, k_b = jax.random.split(key, 3)

    x = jax.random.normal(k_x, (N, Cin, H, W), dtype=jnp.float32)
    fan_in = Cin * 3 * 3
    bound = 1.0 / float(np.sqrt(fan_in))
    w = jax.random.uniform(k_w, (3, 3, Cin, Cout), jnp.float32, -bound, bound)
    b = jax.random.uniform(k_b, (Cout,), jnp.float32, -bound, bound)
    gamma = jnp.ones((Cout,), jnp.float32)   # BatchNorm2d default weight
    beta = jnp.zeros((Cout,), jnp.float32)   # BatchNorm2d default bias

    out = jax.block_until_ready(one_conv(x, w, b, gamma, beta))
    ref = jax.block_until_ready(one_conv_ref(x, w, b, gamma, beta))

    assert out.shape == (N, Cout, H, W)
    assert jnp.allclose(out, ref, rtol=1e-3, atol=1e-3), "mismatch vs reference"

    print("KERNEL_OK")
</pallas_src>

<mosaic_0001>
module attributes {stable_mosaic.version = 11 : i64} {
  func.func @_conv_stats_kernel(%arg0: i32, %arg1: memref<1x16x128xf32, #tpu.memory_space<vmem>>, %arg2: memref<3x128x256xf32, #tpu.memory_space<vmem>>, %arg3: memref<1x16x256xf32, #tpu.memory_space<vmem>>, %arg4: memref<1x2x256xf32, #tpu.memory_space<vmem>>, %arg5: memref<18x128xf32, #tpu.memory_space<vmem>>) attributes {dimension_semantics = [#tpu.dimension_semantics<parallel>], iteration_bounds = array<i64: 2>, scalar_prefetch = 0 : i64, scratch_operands = 1 : i64, tpu.core_type = #tpu.core_type<tc>, window_params = [{transform_indices = @transform_0, window_bounds = array<i64: 1, 16, 128>}, {pipeline_mode = #tpu.pipeline_mode<synchronous>, transform_indices = @transform_1, window_bounds = array<i64: 3, 128, 256>}, {transform_indices = @transform_2, window_bounds = array<i64: 1, 16, 256>}, {transform_indices = @transform_3, window_bounds = array<i64: 1, 2, 256>}]} {
    %cst = arith.constant 0.000000e+00 : f32
    %0 = vector.broadcast %cst : f32 to vector<1x128xf32>
    %c0 = arith.constant 0 : index
    %c0_0 = arith.constant 0 : index
    %1 = vector.load %arg5[%c0, %c0_0] : memref<18x128xf32, #tpu.memory_space<vmem>>, vector<1x128xf32>
    tpu.vector_store %arg5[%c0, %c0_0], %0 {strides = array<i32>} : memref<18x128xf32, #tpu.memory_space<vmem>>, vector<1x128xf32>,
    %cst_1 = arith.constant 0.000000e+00 : f32
    %2 = vector.broadcast %cst_1 : f32 to vector<1x128xf32>
    %c17 = arith.constant 17 : index
    %c0_2 = arith.constant 0 : index
    %3 = vector.load %arg5[%c17, %c0_2] : memref<18x128xf32, #tpu.memory_space<vmem>>, vector<1x128xf32>
    tpu.vector_store %arg5[%c17, %c0_2], %2 {strides = array<i32>} : memref<18x128xf32, #tpu.memory_space<vmem>>, vector<1x128xf32>,
    %c0_3 = arith.constant 0 : index
    %c0_4 = arith.constant 0 : index
    %c0_5 = arith.constant 0 : index
    %4 = vector.load %arg1[%c0_3, %c0_4, %c0_5] : memref<1x16x128xf32, #tpu.memory_space<vmem>>, vector<1x16x128xf32>
    %5 = vector.shape_cast %4 : vector<1x16x128xf32> to vector<16x128xf32>
    %c1 = arith.constant 1 : index
    %c0_6 = arith.constant 0 : index
    %6 = vector.load %arg5[%c1, %c0_6] : memref<18x128xf32, #tpu.memory_space<vmem>>, vector<16x128xf32>
    tpu.vector_store %arg5[%c1, %c0_6], %5 {strides = array<i32>} : memref<18x128xf32, #tpu.memory_space<vmem>>, vector<16x128xf32>,
    %c0_7 = arith.constant 0 : index
    %c0_8 = arith.constant 0 : index
    %7 = vector.load %arg5[%c0_7, %c0_8] : memref<18x128xf32, #tpu.memory_space<vmem>>, vector<16x128xf32>
    %c0_9 = arith.constant 0 : index
    %c0_10 = arith.constant 0 : index
    %c0_11 = arith.constant 0 : index
    %8 = vector.load %arg2[%c0_9, %c0_10, %c0_11] : memref<3x128x256xf32, #tpu.memory_space<vmem>>, vector<1x128x256xf32>
    %9 = vector.shape_cast %8 : vector<1x128x256xf32> to vector<128x256xf32>
    %cst_12 = arith.constant dense<0.000000e+00> : vector<16x256xf32>
    %10 = tpu.matmul %7, %9, %cst_12 {dimension_numbers = #tpu.dot_dimension_numbers<[1], [0], [0], [1], [0, 0, 1, 1], [], []>} : vector<16x128xf32>, vector<128x256xf32>, vector<16x256xf32> -> vector<16x256xf32>
    %c1_13 = arith.constant 1 : index
    %c0_14 = arith.constant 0 : index
    %11 = vector.load %arg5[%c1_13, %c0_14] : memref<18x128xf32, #tpu.memory_space<vmem>>, vector<16x128xf32>
    %c1_15 = arith.constant 1 : index
    %c0_16 = arith.constant 0 : index
    %c0_17 = arith.constant 0 : index
    %12 = vector.load %arg2[%c1_15, %c0_16, %c0_17] : memref<3x128x256xf32, #tpu.memory_space<vmem>>, vector<1x128x256xf32>
    %13 = vector.shape_cast %12 : vector<1x128x256xf32> to vector<128x256xf32>
    %cst_18 = arith.constant dense<0.000000e+00> : vector<16x256xf32>
    %14 = tpu.matmul %11, %13, %cst_18 {dimension_numbers = #tpu.dot_dimension_numbers<[1], [0], [0], [1], [0, 0, 1, 1], [], []>} : vector<16x128xf32>, vector<128x256xf32>, vector<16x256xf32> -> vector<16x256xf32>
    %15 = arith.addf %10, %14 : vector<16x256xf32>
    %c2 = arith.constant 2 : index
    %c0_19 = arith.constant 0 : index
    %16 = vector.load %arg5[%c2, %c0_19] : memref<18x128xf32, #tpu.memory_space<vmem>>, vector<16x128xf32>
    %c2_20 = arith.constant 2 : index
    %c0_21 = arith.constant 0 : index
    %c0_22 = arith.constant 0 : index
    %17 = vector.load %arg2[%c2_20, %c0_21, %c0_22] : memref<3x128x256xf32, #tpu.memory_space<vmem>>, vector<1x128x256xf32>
    %18 = vector.shape_cast %17 : vector<1x128x256xf32> to vector<128x256xf32>
    %cst_23 = arith.constant dense<0.000000e+00> : vector<16x256xf32>
    %19 = tpu.matmul %16, %18, %cst_23 {dimension_numbers = #tpu.dot_dimension_numbers<[1], [0], [0], [1], [0, 0, 1, 1], [], []>} : vector<16x128xf32>, vector<128x256xf32>, vector<16x256xf32> -> vector<16x256xf32>
    %20 = arith.addf %15, %19 : vector<16x256xf32>
    %c0_24 = arith.constant 0 : index
    %c0_25 = arith.constant 0 : index
    %c0_26 = arith.constant 0 : index
    %21 = vector.load %arg3[%c0_24, %c0_25, %c0_26] : memref<1x16x256xf32, #tpu.memory_space<vmem>>, vector<1x16x256xf32>
    %22 = vector.shape_cast %21 : vector<1x16x256xf32> to vector<16x256xf32>
    %23 = vector.shape_cast %20 : vector<16x256xf32> to vector<1x16x256xf32>
    tpu.vector_store %arg3[%c0_24, %c0_25, %c0_26], %23 {strides = array<i32>} : memref<1x16x256xf32, #tpu.memory_space<vmem>>, vector<1x16x256xf32>,
    %cst_27 = arith.constant dense<0.000000e+00> : vector<256xf32>
    %24 = vector.multi_reduction <add>, %20, %cst_27 [0] : vector<16x256xf32> to vector<256xf32>
    %25 = vector.shape_cast %24 : vector<256xf32> to vector<1x256xf32>
    %26 = arith.mulf %20, %20 : vector<16x256xf32>
    %cst_28 = arith.constant dense<0.000000e+00> : vector<256xf32>
    %27 = vector.multi_reduction <add>, %26, %cst_28 [0] : vector<16x256xf32> to vector<256xf32>
    %28 = vector.shape_cast %27 : vector<256xf32> to vector<1x256xf32>
    %29 = tpu.concatenate %25, %28 in 0 : vector<1x256xf32>, vector<1x256xf32> -> vector<2x256xf32>
    %c0_29 = arith.constant 0 : index
    %c0_30 = arith.constant 0 : index
    %c0_31 = arith.constant 0 : index
    %30 = vector.load %arg4[%c0_29, %c0_30, %c0_31] : memref<1x2x256xf32, #tpu.memory_space<vmem>>, vector<1x2x256xf32>
    %31 = vector.shape_cast %30 : vector<1x2x256xf32> to vector<2x256xf32>
    %32 = vector.shape_cast %29 : vector<2x256xf32> to vector<1x2x256xf32>
    tpu.vector_store %arg4[%c0_29, %c0_30, %c0_31], %32 {strides = array<i32>} : memref<1x2x256xf32, #tpu.memory_space<vmem>>, vector<1x2x256xf32>,
    return
  }
  func.func @transform_0(%arg0: i32) -> (i32, i32, i32) {
    %c0_i32 = arith.constant 0 : i32
    %c0_i32_0 = arith.constant 0 : i32
    %c0_i32_1 = arith.constant 0 : i32
    return %arg0, %c0_i32, %c0_i32_0 : i32, i32, i32
  }
  func.func @transform_1(%arg0: i32) -> (i32, i32, i32) {
    %c0_i32 = arith.constant 0 : i32
    %c0_i32_0 = arith.constant 0 : i32
    %c0_i32_1 = arith.constant 0 : i32
    %c0_i32_2 = arith.constant 0 : i32
    return %c0_i32, %c0_i32_0, %c0_i32_1 : i32, i32, i32
  }
  func.func @transform_2(%arg0: i32) -> (i32, i32, i32) {
    %c0_i32 = arith.constant 0 : i32
    %c0_i32_0 = arith.constant 0 : i32
    %c0_i32_1 = arith.constant 0 : i32
    return %arg0, %c0_i32, %c0_i32_0 : i32, i32, i32
  }
  func.func @transform_3(%arg0: i32) -> (i32, i32, i32) {
    %c0_i32 = arith.constant 0 : i32
    %c0_i32_0 = arith.constant 0 : i32
    %c0_i32_1 = arith.constant 0 : i32
    return %arg0, %c0_i32, %c0_i32_0 : i32, i32, i32
  }
}

module attributes {stable_mosaic.version = 11 : i64} {
  func.func @_bn_relu_kernel(%arg0: i32, %arg1: memref<1x16x256xf32, #tpu.memory_space<vmem>>, %arg2: memref<2x256xf32, #tpu.memory_space<vmem>>, %arg3: memref<1x16x256xf32, #tpu.memory_space<vmem>>) attributes {dimension_semantics = [#tpu.dimension_semantics<parallel>], iteration_bounds = array<i64: 2>, scalar_prefetch = 0 : i64, scratch_operands = 0 : i64, tpu.core_type = #tpu.core_type<tc>, window_params = [{transform_indices = @transform_0, window_bounds = array<i64: 1, 16, 256>}, {pipeline_mode = #tpu.pipeline_mode<synchronous>, transform_indices = @transform_1, window_bounds = array<i64: 2, 256>}, {transform_indices = @transform_2, window_bounds = array<i64: 1, 16, 256>}]} {
    %c0 = arith.constant 0 : index
    %c0_0 = arith.constant 0 : index
    %c0_1 = arith.constant 0 : index
    %0 = vector.load %arg1[%c0, %c0_0, %c0_1] : memref<1x16x256xf32, #tpu.memory_space<vmem>>, vector<1x16x256xf32>
    %1 = vector.shape_cast %0 : vector<1x16x256xf32> to vector<16x256xf32>
    %c0_2 = arith.constant 0 : index
    %c0_3 = arith.constant 0 : index
    %2 = vector.load %arg2[%c0_2, %c0_3] : memref<2x256xf32, #tpu.memory_space<vmem>>, vector<1x256xf32>
    %3 = vector.broadcast %2 : vector<1x256xf32> to vector<16x256xf32>
    %4 = arith.mulf %1, %3 : vector<16x256xf32>
    %c1 = arith.constant 1 : index
    %c0_4 = arith.constant 0 : index
    %5 = vector.load %arg2[%c1, %c0_4] : memref<2x256xf32, #tpu.memory_space<vmem>>, vector<1x256xf32>
    %6 = vector.broadcast %5 : vector<1x256xf32> to vector<16x256xf32>
    %7 = arith.addf %4, %6 : vector<16x256xf32>
    %cst = arith.constant 0.000000e+00 : f32
    %8 = vector.broadcast %cst : f32 to vector<16x256xf32>
    %9 = arith.maximumf %7, %8 : vector<16x256xf32>
    %c0_5 = arith.constant 0 : index
    %c0_6 = arith.constant 0 : index
    %c0_7 = arith.constant 0 : index
    %10 = vector.load %arg3[%c0_5, %c0_6, %c0_7] : memref<1x16x256xf32, #tpu.memory_space<vmem>>, vector<1x16x256xf32>
    %11 = vector.shape_cast %10 : vector<1x16x256xf32> to vector<16x256xf32>
    %12 = vector.shape_cast %9 : vector<16x256xf32> to vector<1x16x256xf32>
    tpu.vector_store %arg3[%c0_5, %c0_6, %c0_7], %12 {strides = array<i32>} : memref<1x16x256xf32, #tpu.memory_space<vmem>>, vector<1x16x256xf32>,
    return
  }
  func.func @transform_0(%arg0: i32) -> (i32, i32, i32) {
    %c0_i32 = arith.constant 0 : i32
    %c0_i32_0 = arith.constant 0 : i32
    %c0_i32_1 = arith.constant 0 : i32
    return %arg0, %c0_i32, %c0_i32_0 : i32, i32, i32
  }
  func.func @transform_1(%arg0: i32) -> (i32, i32) {
    %c0_i32 = arith.constant 0 : i32
    %c0_i32_0 = arith.constant 0 : i32
    %c0_i32_1 = arith.constant 0 : i32
    return %c0_i32, %c0_i32_0 : i32, i32
  }
  func.func @transform_2(%arg0: i32) -> (i32, i32, i32) {
    %c0_i32 = arith.constant 0 : i32
    %c0_i32_0 = arith.constant 0 : i32
    %c0_i32_1 = arith.constant 0 : i32
    return %arg0, %c0_i32, %c0_i32_0 : i32, i32, i32
  }
}

</mosaic_0001>

<bundles_post_ra>
// kernel: one_conv.2
= control target key start
LH: loop header
LB: loop body
LE: loop exit
PB: predicated region body
PF: predicated region fallthrough
CT: control target
= control target key end

     0   :  { %s907_s12 = smov 0   ;;  %s1242_s0 = inlined_call_operand.vmem [shape: f32[2,16,128], index: 0, kind: input, shape index: {}]   ;;  %s1243_s1 = inlined_call_operand.vmem [shape: f32[3,128,256], index: 1, kind: input, shape index: {}]   ;;  %s1244_s2 = inlined_call_operand.vmem [shape: f32[2,16,256], index: 2, kind: output, shape index: {0}]   ;;  %s1245_s3 = inlined_call_operand.vmem [shape: f32[2,2,256], index: 3, kind: output, shape index: {1}]  }
   0x1 LB: > { %s668_s13 = sadd.s32 4294967295, %s884_s12   ;;  %p672_p0 = scmp.ge.s32.totalorder %s884_s12, 1  ;;  %s884_s12 = sphi %s907_s12, %s14_s12  }
   0x2   : > { %p140_p1 = scmp.lt.s32.totalorder %s884_s12, 3 }
   0x4   : > { %p141_p2 = pnand %p672_p0, %p140_p1 }
   0x5   : > { %v680_v0 = vld [vmem:[%s1243_s1 + $0x108] sm:$0xff] (!%p141_p2)  ;;  %v682_v1 = vld [vmem:[%s1243_s1 + $0x118] sm:$0xff] (!%p141_p2)  ;;  %v679_v5 = vld [vmem:[%s1243_s1 + $0x100] sm:$0xff] (!%p141_p2)  ;;  %v886_v7 = vmov (!%p141_p2), 0.0   ;;  %p993_p3 = scmp.lt.s32.totalorder (!%p141_p2), %s668_s13, 1  ;;  %vm565_vm0 = vcmask (!%p141_p2), 1040384  }
   0x6   : > { %144 = sbr.rel (%p141_p2) target bundleno = 308 (0x134), region = 28  ;;  %v193_v2 = vld [vmem:[%s1243_s1 + $0x8] sm:$0xff] (!%p141_p2)  ;;  %v749_v3 = vpack.c.bf16 (!%p141_p2), %v682_v1, %v680_v0  ;;  %v195_v4 = vld [vmem:[%s1243_s1 + $0x18] sm:$0xff] (!%p141_p2)  ;;  %v681_v6 = vld [vmem:[%s1243_s1 + $0x110] sm:$0xff] (!%p141_p2)  ;;  %184 = vst [vmem:[#allocation2] sm:$0x1] (!%p141_p2), %v886_v7  ;;  %323 = vmatprep.mubr.f32.mxu1 (!%p141_p2), %v886_v7  ;;  %400 = vmatprep.mubr.f32.mxu0 (!%p141_p2), %v886_v7 }
   0x7   : > { %185 = vst [vmem:[#allocation2 + $0x11] sm:$0x1] (!%p141_p2), %v886_v7  ;;  %v781_v8 = vpack.c.bf16 (!%p141_p2), %v195_v4, %v193_v2  ;;  %v751_v9 = vpack.c.bf16 (!%p141_p2), %v681_v6, %v679_v5  ;;  %v192_v10 = vld [vmem:[%s1243_s1] sm:$0xff] (!%p141_p2)  ;;  %v194_v11 = vld [vmem:[%s1243_s1 + $0x10] sm:$0xff] (!%p141_p2)  ;;  %v684_v12 = vld [vmem:[%s1243_s1 + $0x128] sm:$0xff] (!%p141_p2) }
   0x8   : > { %750 = vmatprep.subr.bf16.mxu1 (!%p141_p2), %v749_v3  ;;  %v783_v13 = vpack.c.bf16 (!%p141_p2), %v194_v11, %v192_v10  ;;  %v686_v14 = vld [vmem:[%s1243_s1 + $0x138] sm:$0xff] (!%p141_p2)  ;;  %v197_v15 = vld [vmem:[%s1243_s1 + $0x28] sm:$0xff] (!%p141_p2)  ;;  %v683_v19 = vld [vmem:[%s1243_s1 + $0x120] sm:$0xff] (!%p141_p2) }
   0x9   : > { %v199_v16 = vld [vmem:[%s1243_s1 + $0x38] sm:$0xff] (!%p141_p2)  ;;  %782 = vmatprep.subr.bf16.mxu0 (!%p141_p2), %v781_v8  ;;  %752 = vmatpush1.bf16.msra.mxu1 (!%p141_p2), %v751_v9  ;;  %v753_v17 = vpack.c.bf16 (!%p141_p2), %v686_v14, %v684_v12  ;;  %v685_v20 = vld [vmem:[%s1243_s1 + $0x130] sm:$0xff] (!%p141_p2)  ;;  %v196_v21 = vld [vmem:[%s1243_s1 + $0x20] sm:$0xff] (!%p141_p2) }
   0xa   : > { %v785_v18 = vpack.c.bf16 (!%p141_p2), %v199_v16, %v197_v15  ;;  %784 = vmatpush1.bf16.msra.mxu0 (!%p141_p2), %v783_v13  ;;  %v755_v22 = vpack.c.bf16 (!%p141_p2), %v685_v20, %v683_v19  ;;  %v198_v23 = vld [vmem:[%s1243_s1 + $0x30] sm:$0xff] (!%p141_p2)  ;;  %v688_v24 = vld [vmem:[%s1243_s1 + $0x148] sm:$0xff] (!%p141_p2)  ;;  %v690_v25 = vld [vmem:[%s1243_s1 + $0x158] sm:$0xff] (!%p141_p2) }
   0xb   : > { %754 = vmatprep.subr.bf16.mxu1 (!%p141_p2), %v753_v17  ;;  %v787_v26 = vpack.c.bf16 (!%p141_p2), %v198_v23, %v196_v21  ;;  %v757_v27 = vpack.c.bf16 (!%p141_p2), %v690_v25, %v688_v24  ;;  %v201_v28 = vld [vmem:[%s1243_s1 + $0x48] sm:$0xff] (!%p141_p2)  ;;  %v203_v29 = vld [vmem:[%s1243_s1 + $0x58] sm:$0xff] (!%p141_p2)  ;;  %v687_v30 = vld [vmem:[%s1243_s1 + $0x140] sm:$0xff] (!%p141_p2) }
   0xc   : > { %786 = vmatprep.subr.bf16.mxu0 (!%p141_p2), %v785_v18  ;;  %v789_v31 = vpack.c.bf16 (!%p141_p2), %v203_v29, %v201_v28  ;;  %v689_v32 = vld [vmem:[%s1243_s1 + $0x150] sm:$0xff] (!%p141_p2)  ;;  %v200_v33 = vld [vmem:[%s1243_s1 + $0x40] sm:$0xff] (!%p141_p2)  ;;  %v692_v36 = vld [vmem:[%s1243_s1 + $0x168] sm:$0xff] (!%p141_p2) }
   0xd   : > { %v202_v34 = vld [vmem:[%s1243_s1 + $0x50] sm:$0xff]  ;;  %756 = vmatpush1.bf16.msra.mxu1 %v755_v22  ;;  %v759_v35 = vpack.c.bf16 %v689_v32, %v687_v30  ;;  %v694_v37 = vld [vmem:[%s1243_s1 + $0x178] sm:$0xff]  ;;  %v205_v38 = vld [vmem:[%s1243_s1 + $0x68] sm:$0xff]  ;;  %s1248_s13 = smov (!%p993_p3, %s668_s13), 1 }
   0xe   : > { %788 = vmatpush1.bf16.msra.mxu0 %v787_v26  ;;  %758 = vmatprep.subr.bf16.mxu1 %v757_v27  ;;  %v791_v39 = vpack.c.bf16 %v202_v34, %v200_v33  ;;  %v761_v40 = vpack.c.bf16 %v694_v37, %v692_v36  ;;  %v207_v41 = vld [vmem:[%s1243_s1 + $0x78] sm:$0xff]  ;;  %v691_v42 = vld [vmem:[%s1243_s1 + $0x160] sm:$0xff]  ;;  %v693_v43 = vld [vmem:[%s1243_s1 + $0x170] sm:$0xff]  ;;  %s746_s28 = sshll.u32 %s1248_s13, 4  ;;  %s747_s11 = sshll.u32 %s1248_s13, 5 }
   0xf   : > { %790 = vmatprep.subr.bf16.mxu0 %v789_v31  ;;  %v793_v44 = vpack.c.bf16 %v207_v41, %v205_v38  ;;  %v204_v45 = vld [vmem:[%s1243_s1 + $0x60] sm:$0xff]  ;;  %v206_v46 = vld [vmem:[%s1243_s1 + $0x70] sm:$0xff]  ;;  %v696_v47 = vld [vmem:[%s1243_s1 + $0x188] sm:$0xff]  ;;  %v763_v51 = vpack.c.bf16 %v693_v43, %v691_v42  ;;  %s1085_s10 = scalar_lea.vmem %s1242_s0, %s746_s28  ;;  %s178_s16 = scalar_lea.vmem %s1244_s2, %s747_s11 }
  0x10   : > { %v698_v48 = vld [vmem:[%s1243_s1 + $0x198] sm:$0xff]  ;;  %v209_v49 = vld [vmem:[%s1243_s1 + $0x88] sm:$0xff]  ;;  %v795_v52 = vpack.c.bf16 %v206_v46, %v204_v45  ;;  %v695_v54 = vld [vmem:[%s1243_s1 + $0x180] sm:$0xff] }
  0x11   : > { %v211_v50 = vld [vmem:[%s1243_s1 + $0x98] sm:$0xff]  ;;  %760 = vmatpush1.bf16.msra.mxu1 %v759_v35  ;;  %v765_v53 = vpack.c.bf16 %v698_v48, %v696_v47  ;;  %v697_v55 = vld [vmem:[%s1243_s1 + $0x190] sm:$0xff]  ;;  %v208_v56 = vld [vmem:[%s1243_s1 + $0x80] sm:$0xff] }
  0x12   : > { %792 = vmatpush1.bf16.msra.mxu0 %v791_v39  ;;  %762 = vmatprep.subr.bf16.mxu1 %v761_v40  ;;  %v797_v57 = vpack.c.bf16 %v211_v50, %v209_v49  ;;  %v210_v58 = vld [vmem:[%s1243_s1 + $0x90] sm:$0xff]  ;;  %v700_v59 = vld [vmem:[%s1243_s1 + $0x1a8] sm:$0xff]  ;;  %v702_v60 = vld [vmem:[%s1243_s1 + $0x1b8] sm:$0xff]  ;;  %v767_v63 = vpack.c.bf16 %v697_v55, %v695_v54 }
  0x13   : > { %794 = vmatprep.subr.bf16.mxu0 %v793_v44  ;;  %v213_v61 = vld [vmem:[%s1243_s1 + $0xa8] sm:$0xff]  ;;  %v215_v62 = vld [vmem:[%s1243_s1 + $0xb8] sm:$0xff]  ;;  %v799_v0 = vpack.c.bf16 %v210_v58, %v208_v56  ;;  %v769_v1 = vpack.c.bf16 %v702_v60, %v700_v59  ;;  %v699_v2 = vld [vmem:[%s1243_s1 + $0x1a0] sm:$0xff] }
  0x14   : > { %v701_v3 = vld [vmem:[%s1243_s1 + $0x1b0] sm:$0xff]  ;;  %v212_v4 = vld [vmem:[%s1243_s1 + $0xa0] sm:$0xff]  ;;  %v801_v5 = vpack.c.bf16 %v215_v62, %v213_v61  ;;  %v704_v8 = vld [vmem:[%s1243_s1 + $0x1c8] sm:$0xff] }
  0x15   : > { %764 = vmatpush1.bf16.msra.mxu1 %v763_v51  ;;  %v214_v6 = vld [vmem:[%s1243_s1 + $0xb0] sm:$0xff]  ;;  %v706_v9 = vld [vmem:[%s1243_s1 + $0x1d8] sm:$0xff]  ;;  %v217_v10 = vld [vmem:[%s1243_s1 + $0xc8] sm:$0xff]  ;;  %v771_v12 = vpack.c.bf16 %v701_v3, %v699_v2 }
  0x16   : > { %796 = vmatpush1.bf16.msra.mxu0 %v795_v52  ;;  %766 = vmatprep.subr.bf16.mxu1 %v765_v53  ;;  %v219_v11 = vld [vmem:[%s1243_s1 + $0xd8] sm:$0xff]  ;;  %v703_v13 = vld [vmem:[%s1243_s1 + $0x1c0] sm:$0xff]  ;;  %v803_v14 = vpack.c.bf16 %v214_v6, %v212_v4  ;;  %v773_v15 = vpack.c.bf16 %v706_v9, %v704_v8  ;;  %v705_v16 = vld [vmem:[%s1243_s1 + $0x1d0] sm:$0xff] }
  0x17   : > { %798 = vmatprep.subr.bf16.mxu0 %v797_v57  ;;  %v216_v17 = vld [vmem:[%s1243_s1 + $0xc0] sm:$0xff]  ;;  %v805_v19 = vpack.c.bf16 %v219_v11, %v217_v10  ;;  %v218_v20 = vld [vmem:[%s1243_s1 + $0xd0] sm:$0xff]  ;;  %v708_v21 = vld [vmem:[%s1243_s1 + $0x1e8] sm:$0xff]  ;;  %v775_v25 = vpack.c.bf16 %v705_v16, %v703_v13 }
  0x18   : > { %v186_v18 = vld [vmem:[%s1085_s10] sm:$0xff]  ;;  %v710_v22 = vld [vmem:[%s1243_s1 + $0x1f8] sm:$0xff]  ;;  %v221_v23 = vld [vmem:[%s1243_s1 + $0xe8] sm:$0xff]  ;;  %v807_v26 = vpack.c.bf16 %v218_v20, %v216_v17 }
  0x19   : > { %768 = vmatpush1.bf16.msra.mxu1 %v767_v63  ;;  %188 = vst [vmem:[#allocation2 + $0x1] sm:$0xff] %v186_v18  ;;  %v223_v24 = vld [vmem:[%s1243_s1 + $0xf8] sm:$0xff]  ;;  %v777_v27 = vpack.c.bf16 %v710_v22, %v708_v21  ;;  %v707_v28 = vld [vmem:[%s1243_s1 + $0x1e0] sm:$0xff]  ;;  %v709_v29 = vld [vmem:[%s1243_s1 + $0x1f0] sm:$0xff] }
  0x1a   : > { %800 = vmatpush1.bf16.msra.mxu0 %v799_v0  ;;  %770 = vmatprep.subr.bf16.mxu1 %v769_v1  ;;  %v220_v30 = vld [vmem:[%s1243_s1 + $0xe0] sm:$0xff]  ;;  %v809_v31 = vpack.c.bf16 %v223_v24, %v221_v23  ;;  %v222_v32 = vld [vmem:[%s1243_s1 + $0xf0] sm:$0xff]  ;;  %v712_v33 = vld [vmem:[%s1243_s1 + $0x208] sm:$0xff]  ;;  %v779_v35 = vpack.c.bf16 %v709_v29, %v707_v28 }
  0x1b   : > { %802 = vmatprep.subr.bf16.mxu0 %v801_v5  ;;  %v714_v34 = vld [vmem:[%s1243_s1 + $0x218] sm:$0xff]  ;;  %v811_v36 = vpack.c.bf16 %v222_v32, %v220_v30  ;;  %v711_v38 = vld [vmem:[%s1243_s1 + $0x200] sm:$0xff]  ;;  %v713_v39 = vld [vmem:[%s1243_s1 + $0x210] sm:$0xff] }
  0x1c   : > { %v813_v37 = vpack.c.bf16 %v714_v34, %v712_v33  ;;  %v716_v40 = vld [vmem:[%s1243_s1 + $0x228] sm:$0xff]  ;;  %v718_v41 = vld [vmem:[%s1243_s1 + $0x238] sm:$0xff]  ;;  %v815_v43 = vpack.c.bf16 %v713_v39, %v711_v38  ;;  %v715_v46 = vld [vmem:[%s1243_s1 + $0x220] sm:$0xff] }
  0x1d   : > { %772 = vmatpush1.bf16.msra.mxu1 %v771_v12  ;;  %v187_v42 = vld [vmem:[%s1085_s10 + $0x8] sm:$0xff]  ;;  %v817_v45 = vpack.c.bf16 %v718_v41, %v716_v40  ;;  %v717_v47 = vld [vmem:[%s1243_s1 + $0x230] sm:$0xff]  ;;  %v722_v49 = vld [vmem:[%s1243_s1 + $0x258] sm:$0xff]  ;;  %s748_s10 = sshll.u32 %s1248_s13, 2 }
  0x1e   : > { %804 = vmatpush1.bf16.msra.mxu0 %v803_v14  ;;  %774 = vmatprep.subr.bf16.mxu1 %v773_v15  ;;  %189 = vst [vmem:[#allocation2 + $0x9] sm:$0xff] %v187_v42  ;;  %v720_v48 = vld [vmem:[%s1243_s1 + $0x248] sm:$0xff]  ;;  %v819_v50 = vpack.c.bf16 %v717_v47, %v715_v46  ;;  %v719_v52 = vld [vmem:[%s1243_s1 + $0x240] sm:$0xff]  ;;  %v721_v53 = vld [vmem:[%s1243_s1 + $0x250] sm:$0xff]  ;;  %s183_s19 = scalar_lea.vmem %s1245_s3, %s748_s10 }
  0x1f   : > { %806 = vmatprep.subr.bf16.mxu0 %v805_v19  ;;  %v821_v51 = vpack.c.bf16 %v722_v49, %v720_v48  ;;  %v724_v54 = vld [vmem:[%s1243_s1 + $0x268] sm:$0xff]  ;;  %v726_v55 = vld [vmem:[%s1243_s1 + $0x278] sm:$0xff]  ;;  %v823_v57 = vpack.c.bf16 %v721_v53, %v719_v52  ;;  %v723_v59 = vld [vmem:[%s1243_s1 + $0x260] sm:$0xff] }
  0x20   : > { %v190_v44 = vld [vmem:[#allocation2] sm:$0xff]  ;;  %v825_v58 = vpack.c.bf16 %v726_v55, %v724_v54  ;;  %v725_v60 = vld [vmem:[%s1243_s1 + $0x270] sm:$0xff]  ;;  %v728_v61 = vld [vmem:[%s1243_s1 + $0x288] sm:$0xff] }
  0x21   : > { %776 = vmatpush1.bf16.msra.mxu1 %v775_v25  ;;  %v730_v62 = vld [vmem:[%s1243_s1 + $0x298] sm:$0xff]  ;;  %v827_v63 = vpack.c.bf16 %v725_v60, %v723_v59  ;;  %v727_v1 = vld [vmem:[%s1243_s1 + $0x280] sm:$0xff]  ;;  %v729_v2 = vld [vmem:[%s1243_s1 + $0x290] sm:$0xff] }
  0x22   : > { %808 = vmatpush1.bf16.msra.mxu0 %v807_v26  ;;  %778 = vmatprep.subr.bf16.mxu1 %v777_v27  ;;  %v829_v0 = vpack.c.bf16 %v730_v62, %v728_v61  ;;  %v732_v3 = vld [vmem:[%s1243_s1 + $0x2a8] sm:$0xff]  ;;  %v831_v4 = vpack.c.bf16 %v729_v2, %v727_v1  ;;  %v731_v6 = vld [vmem:[%s1243_s1 + $0x2a0] sm:$0xff]  ;;  %v733_v8 = vld [vmem:[%s1243_s1 + $0x2b0] sm:$0xff] }
  0x23   : > { %810 = vmatprep.subr.bf16.mxu0 %v809_v31  ;;  %v736_v9 = vld [vmem:[%s1243_s1 + $0x2c8] sm:$0xff]  ;;  %v738_v10 = vld [vmem:[%s1243_s1 + $0x2d8] sm:$0xff]  ;;  %v835_v11 = vpack.c.bf16 %v733_v8, %v731_v6  ;;  %v735_v13 = vld [vmem:[%s1243_s1 + $0x2c0] sm:$0xff] }
  0x24   : > { %v837_v12 = vpack.c.bf16 %v738_v10, %v736_v9  ;;  %v737_v14 = vld [vmem:[%s1243_s1 + $0x2d0] sm:$0xff]  ;;  %v740_v15 = vld [vmem:[%s1243_s1 + $0x2e8] sm:$0xff]  ;;  %v742_v16 = vld [vmem:[%s1243_s1 + $0x2f8] sm:$0xff] }
  0x25   : > { %780 = vmatpush1.bf16.msra.mxu1 %v779_v35  ;;  %v191_v56 = vld [vmem:[#allocation2 + $0x8] sm:$0xff]  ;;  %v839_v17 = vpack.c.bf16 %v737_v14, %v735_v13  ;;  %v739_v19 = vld [vmem:[%s1243_s1 + $0x2e0] sm:$0xff]  ;;  %v741_v20 = vld [vmem:[%s1243_s1 + $0x2f0] sm:$0xff] }
  0x26   : > { %812 = vmatpush1.bf16.msra.mxu0 %v811_v36  ;;  %845 = vmatprep.subr.bf16.mxu1 %v813_v37  ;;  %v843_v21 = vpack.c.bf16 %v741_v20, %v739_v19  ;;  %v414_v22 = vld [vmem:[#allocation2 + $0xa] sm:$0xff]  ;;  %v413_v23 = vld [vmem:[#allocation2 + $0x2] sm:$0xff] }
  0x27   : > { %814 = vmatprep.subr.bf16.mxu0 %v813_v37 }
  0x28   : > { %324 = vmatmul.mubr.f32.vlgmr.msra.gmra.mrb[0].mxu1 %v186_v18  ;;  %v841_v18 = vpack.c.bf16 %v742_v16, %v740_v15 }
  0x29   : > { %401 = vmatmul.mubr.f32.vlgmr.msra.gmra.mrb[0].mxu0 %v190_v44  ;;  %853 = vmatpush1.bf16.msra.mxu1 %v815_v43 }
  0x2a   : > { %816 = vmatpush1.bf16.msra.mxu0 %v815_v43  ;;  %846 = vmatprep.subr.bf16.mxu1 %v817_v45 }
  0x2b   : > { %818 = vmatprep.subr.bf16.mxu0 %v817_v45  ;;  %329 = vmatprep.mubr.f32.mxu1 %v886_v7 }
  0x2c   : > { %406 = vmatprep.mubr.f32.mxu0 %v886_v7  ;;  %330 = vmatmul.mubr.f32.gmra.mrb[2].mxu1 %v187_v42 }
  0x2d   : > { %854 = vmatpush1.bf16.msra.mxu1 %v819_v50  ;;  %407 = vmatmul.mubr.f32.gmra.mrb[2].mxu0 %v191_v56 }
  0x2e   : > { %820 = vmatpush1.bf16.msra.mxu0 %v819_v50  ;;  %847 = vmatprep.subr.bf16.mxu1 %v821_v51 }
  0x2f   : > { %822 = vmatprep.subr.bf16.mxu0 %v821_v51  ;;  %512 = vmatprep.mubr.f32.mxu0 %v886_v7 }
  0x30   : > { %518 = vmatprep.mubr.f32.mxu1 %v886_v7  ;;  %v734_v7 = vld [vmem:[%s1243_s1 + $0x2b8] sm:$0xff] }
  0x31   : > { %855 = vmatpush1.bf16.msra.mxu1 %v823_v57  ;;  %v833_v5 = vpack.c.bf16 %v734_v7, %v732_v3 }
  0x32   : > { %824 = vmatpush1.bf16.msra.mxu0 %v823_v57  ;;  %848 = vmatprep.subr.bf16.mxu1 %v825_v58 }
  0x33   : > { %826 = vmatprep.subr.bf16.mxu0 %v825_v58 }
  0x35   : > { %856 = vmatpush1.bf16.msra.mxu1 %v827_v63 }
  0x36   : > { %828 = vmatpush1.bf16.msra.mxu0 %v827_v63  ;;  %849 = vmatprep.subr.bf16.mxu1 %v829_v0 }
  0x37   : > { %830 = vmatprep.subr.bf16.mxu0 %v829_v0 }
  0x39   : > { %857 = vmatpush1.bf16.msra.mxu1 %v831_v4 }
  0x3a   : > { %832 = vmatpush1.bf16.msra.mxu0 %v831_v4  ;;  %850 = vmatprep.subr.bf16.mxu1 %v833_v5 }
  0x3b   : > { %834 = vmatprep.subr.bf16.mxu0 %v833_v5 }
  0x3d   : > { %858 = vmatpush1.bf16.msra.mxu1 %v835_v11 }
  0x3e   : > { %836 = vmatpush1.bf16.msra.mxu0 %v835_v11  ;;  %851 = vmatprep.subr.bf16.mxu1 %v837_v12 }
  0x3f   : > { %838 = vmatprep.subr.bf16.mxu0 %v837_v12 }
  0x41   : > { %859 = vmatpush1.bf16.msra.mxu1 %v839_v17 }
  0x42   : > { %840 = vmatpush1.bf16.msra.mxu0 %v839_v17  ;;  %852 = vmatprep.subr.bf16.mxu1 %v841_v18 }
  0x43   : > { %842 = vmatprep.subr.bf16.mxu0 %v841_v18 }
  0x45   : > { %860 = vmatpush1.bf16.msra.mxu1 %v843_v21 }
  0x46   : > { %844 = vmatpush1.bf16.msra.mxu0 %v843_v21 }
  0x48   : > { %519 = vmatmul.mubr.f32.vlgmr.msra.gmra.mrb[4].mxu1 %v414_v22 }
  0x49   : > { %513 = vmatmul.mubr.f32.vlgmr.msra.gmra.mrb[0].mxu0 %v413_v23 }
  0xfb   : > { %v325_v24 = vpop.f32.mrb[0].mxu1 }
  0xfc   : > { %v327_v25 = vpop.f32.mrb[1].mxu1 }
  0xff   : > { %v331_v26 = vpop.f32.mrb[2].mxu1 }
 0x100   : > { %v408_v27 = vpop.f32.mrb[2].mxu0  ;;  %v333_v28 = vpop.f32.mrb[3].mxu1 }
 0x101   : > { %v409_v29 = vadd.f32 %v408_v27, %v331_v26  ;;  %v410_v30 = vpop.f32.mrb[3].mxu0 }
 0x102   : > { %v411_v31 = vadd.f32 %v410_v30, %v333_v28 }
 0x11b   : > { %v520_v32 = vpop.f32.mrb[4].mxu1 }
 0x11c   : > { %v514_v33 = vpop.f32.mrb[0].mxu0  ;;  %v527_v34 = vadd.f32 %v520_v32, %v409_v29  ;;  %v522_v35 = vpop.f32.mrb[5].mxu1 }
 0x11d   : > { %v861_v36 = vadd.f32 %v514_v33, %v325_v24  ;;  %v516_v37 = vpop.f32.mrb[1].mxu0  ;;  %v528_v38 = vadd.f32 %v522_v35, %v411_v31 }
 0x11e   : > { %531 = vst [vmem:[%s178_s16 + $0x10] sm:$0xff] %v527_v34  ;;  %v549_v39 = vmul.f32 %v527_v34, %v527_v34  ;;  %v862_v40 = vadd.f32 %v516_v37, %v327_v25 }
 0x11f   : > { %529 = vst [vmem:[%s178_s16] sm:$0xff] %v861_v36  ;;  %v547_v41 = vmul.f32 %v861_v36, %v861_v36  ;;  %v533_v42 = vadd.f32 %v861_v36, %v527_v34  ;;  %532 = vst [vmem:[%s178_s16 + $0x18] sm:$0xff] %v528_v38  ;;  %v550_v43 = vmul.f32 %v528_v38, %v528_v38 }
 0x120   : > { %530 = vst [vmem:[%s178_s16 + $0x8] sm:$0xff] %v862_v40  ;;  %v548_v44 = vmul.f32 %v862_v40, %v862_v40  ;;  %v540_v45 = vadd.f32 %v862_v40, %v528_v38 }
 0x121   : > { %v534_v46 = vrot.slane %v533_v42, 4  ;;  %v551_v47 = vadd.f32 %v549_v39, %v547_v41 }
 0x122   : > { %v541_v48 = vrot.slane %v540_v45, 4  ;;  %v558_v49 = vadd.f32 %v550_v43, %v548_v44 }
 0x123   : > { %v535_v50 = vadd.f32 %v534_v46, %v533_v42  ;;  %v552_v51 = vrot.slane %v551_v47, 4 }
 0x124   : > { %v542_v52 = vadd.f32 %v541_v48, %v540_v45  ;;  %v559_v53 = vrot.slane %v558_v49, 4 }
 0x125   : > { %v536_v54 = vrot.slane %v535_v50, 2  ;;  %v553_v55 = vadd.f32 %v552_v51, %v551_v47 }
 0x126   : > { %v543_v56 = vrot.slane %v542_v52, 2  ;;  %v560_v57 = vadd.f32 %v559_v53, %v558_v49 }
 0x127   : > { %v537_v58 = vadd.f32 %v536_v54, %v535_v50  ;;  %v554_v59 = vrot.slane %v553_v55, 2 }
 0x128   : > { %v544_v60 = vadd.f32 %v543_v56, %v542_v52  ;;  %v561_v61 = vrot.slane %v560_v57, 2 }
 0x129   : > { %v538_v62 = vrot.slane %v537_v58, 1  ;;  %v555_v63 = vadd.f32 %v554_v59, %v553_v55 }
 0x12a   : > { %v545_v0 = vrot.slane %v544_v60, 1  ;;  %v562_v1 = vadd.f32 %v561_v61, %v560_v57 }
 0x12b   : > { %v556_v2 = vrot.slane %v555_v63, 1  ;;  %v539_v7 = vadd.f32 %v538_v62, %v537_v58 }
 0x12c   : > { %v563_v3 = vrot.slane %v562_v1, 1  ;;  %v546_v5 = vadd.f32 %v545_v0, %v544_v60 }
 0x12d   : > { %v557_v4 = vadd.f32 %v556_v2, %v555_v63 }
 0x12e   : > { %v564_v6 = vadd.f32 %v563_v3, %v562_v1 }
 0x12f   : > { %v566_v8 = vsel %vm565_vm0, %v539_v7, %v557_v4 }
 0x130   : > { %v567_v9 = vsel %vm565_vm0, %v546_v5, %v564_v6 }
 0x131   : > { %v570_v10 = vcombine.low %v566_v8, %v567_v9 }
 0x133   : > { %743 = vst.sshfl [vmem:[%s183_s19] sm:$0x33 pattern:$0x76325410] %v570_v10 }
 0x134 PF: > { %s14_s12 = sadd.s32 1, %s884_s12  }
 0x135   : > { %p11_p4 = scmp.ge.s32.totalorder %s14_s12, 4  }
 0x137   :  { %13 = sbr.rel (!%p11_p4) target bundleno = 1 (0x1), region = 72 }

// kernel: tile.13
= control target key start
LH: loop header
LB: loop body
LE: loop exit
PB: predicated region body
PF: predicated region fallthrough
CT: control target
= control target key end

     0   :  { %s28_s0 = inlined_call_operand.vmem [shape: f32[16], index: 0, kind: input, shape index: {}]   ;;  %s29_s1 = inlined_call_operand.vmem [shape: f32[16,16], index: 1, kind: output, shape index: {}]  }
   0x1   :  { %v4_v0 = vld [vmem:[%s28_s0] ss:$0 sm:$0xff] }
   0x2   :  { %5 = vst [vmem:[%s29_s1] sm:$0xff] %v4_v0  ;;  %8 = vst [vmem:[%s29_s1 + $0x8] sm:$0xff] %v4_v0 }

// kernel: tile.18
= control target key start
LH: loop header
LB: loop body
LE: loop exit
PB: predicated region body
PF: predicated region fallthrough
CT: control target
= control target key end

     0   :  { %s7_s6 = smov 3  ;;  %s21_s9 = smov 3  ;;  %vm4_vm0 = vcmask 130048   ;;  %vm11_vm1 = vcmask 1048448   ;;  %vm18_vm2 = vcmask 917248   ;;  %vm25_vm3 = vcmask 786048   ;;  %s128_s0 = inlined_call_operand.vmem [shape: f32[16,16], index: 0, kind: input, shape index: {}]   ;;  %s129_s1 = inlined_call_operand.vmem [shape: f32[1,256], index: 1, kind: output, shape index: {}]  }
   0x1   :  { %v66_v0 = vld [vmem:[%s128_s0 + $0x7] ss:$8 sm:%s7_s6]   ;;  %s81_s10 = smov 112   ;;  %v68_v1 = vld [vmem:[%s128_s0 + $0x5] ss:$8 sm:%s21_s9]   ;;  %s14_s13 = smov 3 }
   0x2   :  { %9 = vrot.lane.b32.xlu0 %v66_v0, %s81_s10  ;;  %s82_s14 = smov 80   ;;  %v67_v2 = vld [vmem:[%s128_s0 + $0x6] ss:$8 sm:%s14_s13]   ;;  %s28_s17 = smov 3  ;;  %vm32_vm4 = vcmask 654848   ;;  %vm39_vm5 = vcmask 523648  }
   0x3   :  { %23 = vrot.lane.b32.xlu1 %v68_v1, %s82_s14  ;;  %v69_v3 = vld [vmem:[%s128_s0 + $0x4] ss:$8 sm:%s28_s17]   ;;  %s35_s20 = smov 3  ;;  %s42_s21 = smov 3  ;;  %vm46_vm6 = vcmask 392448   ;;  %vm53_vm7 = vcmask 261248  }
   0x4   :  { %s83_s22 = smov 96   ;;  %s84_s23 = smov 64   ;;  %v70_v4 = vld [vmem:[%s128_s0 + $0x3] ss:$8 sm:%s35_s20]   ;;  %v71_v5 = vld [vmem:[%s128_s0 + $0x2] ss:$8 sm:%s42_s21]  }
   0x5   :  { %s2_s26 = smov 3  ;;  %s49_s29 = smov 3 }
   0x6   :  { %16 = vrot.lane.b32.xlu0 %v67_v2, %s83_s22  ;;  %v3_v6 = vld [vmem:[%s128_s0] ss:$8 sm:%s2_s26]   ;;  %s85_s3 = smov 48   ;;  %s86_s4 = smov 32  }
   0x7   :  { %30 = vrot.lane.b32.xlu1 %v69_v3, %s84_s23  ;;  %5 = vst.msk [vmem:[#allocation0] ss:$8 sm:$0x3] %vm4_vm0, %v3_v6   ;;  %v72_v7 = vld [vmem:[%s128_s0 + $0x1] ss:$8 sm:%s49_s29]   ;;  %s87_s0 = smov 16  }
   0xa   :  { %37 = vrot.lane.b32.xlu0 %v70_v4, %s85_s3 }
   0xb   :  { %44 = vrot.lane.b32.xlu1 %v71_v5, %s86_s4 }
   0xe   :  { %51 = vrot.lane.b32.xlu0 %v72_v7, %s87_s0 }
  0x74   :  { %v10_v8 = vpop.permute.xlu0 %9  }
  0x75   :  { %12 = vst.msk [vmem:[#allocation0] ss:$8 sm:$0x3] %vm11_vm1, %v10_v8   ;;  %v24_v9 = vpop.permute.xlu1 %23  }
  0x78   :  { %v17_v10 = vpop.permute.xlu0 %16  }
  0x79   :  { %19 = vst.msk [vmem:[#allocation0] ss:$8 sm:$0x3] %vm18_vm2, %v17_v10   ;;  %v31_v11 = vpop.permute.xlu1 %30  }
  0x7a   :  { %26 = vst.msk [vmem:[#allocation0] ss:$8 sm:$0x3] %vm25_vm3, %v24_v9  }
  0x7b   :  { %33 = vst.msk [vmem:[#allocation0] ss:$8 sm:$0x3] %vm32_vm4, %v31_v11  }
  0x7c   :  { %v38_v12 = vpop.permute.xlu0 %37  }
  0x7d   :  { %40 = vst.msk [vmem:[#allocation0] ss:$8 sm:$0x3] %vm39_vm5, %v38_v12   ;;  %v45_v13 = vpop.permute.xlu1 %44  }
  0x7e   :  { %47 = vst.msk [vmem:[#allocation0] ss:$8 sm:$0x3] %vm46_vm6, %v45_v13  }
  0x80   :  { %v52_v14 = vpop.permute.xlu0 %51  }
  0x81   :  { %54 = vst.msk [vmem:[#allocation0] ss:$8 sm:$0x3] %vm53_vm7, %v52_v14  }
  0x88   :  { %v58_v15 = vld [vmem:[#allocation0] sm:$0x1]  ;;  %v62_v16 = vld [vmem:[#allocation0 + $0x8] sm:$0x1] }
  0x89   :  { %60 = vst [vmem:[%s129_s1] sm:$0x1] %v58_v15  ;;  %73 = vst [vmem:[%s129_s1 + $0x1] sm:$0x1] %v62_v16 }

// kernel: one_conv.3
= control target key start
LH: loop header
LB: loop body
LE: loop exit
PB: predicated region body
PF: predicated region fallthrough
CT: control target
= control target key end

     0   :  { %s289_s9 = smov 0   ;;  %s312_s0 = inlined_call_operand.vmem [shape: f32[2,16,256], index: 0, kind: input, shape index: {}, may-alias: {0,2}]   ;;  %s313_s1 = inlined_call_operand.vmem [shape: f32[2,256], index: 1, kind: input, shape index: {}]   ;;  %s314_s2 = inlined_call_operand.vmem [shape: f32[2,16,256], index: 2, kind: output, shape index: {}, may-alias: {0,2}]  }
   0x1 LB: > { %s244_s10 = sadd.s32 4294967295, %s272_s9   ;;  %p248_p0 = scmp.ge.s32.totalorder %s272_s9, 1  ;;  %s272_s9 = sphi %s289_s9, %s12_s9  }
   0x2   : > { %p112_p1 = scmp.lt.s32.totalorder %s272_s9, 3 }
   0x4   : > { %p113_p2 = pnand %p248_p0, %p112_p1 }
   0x5   : > { %p134_p3 = scmp.lt.s32.totalorder (!%p113_p2), %s244_s10, 1  ;;  %v150_v0 = vlaneseq (!%p113_p2)  ;;  %v148_v2 = vld [vmem:[%s313_s1] ss:$2 sm:$0x3] (!%p113_p2) }
   0x6   : > { %116 = sbr.rel (%p113_p2) target bundleno = 25 (0x19), region = 28  ;;  %v253_v3 = vld [vmem:[%s313_s1 + $0x1] ss:$2 sm:$0x3] (!%p113_p2) }
   0x7   : > { %v151_v1 = vshrl.u32 (!%p113_p2), %v150_v0, 7 }
   0x9   : > { %v152_v4 = vsub.s32 (!%p113_p2), 0, %v151_v1  ;;  %v156_v5 = vsub.s32 (!%p113_p2), 1, %v151_v1 }
   0xb   : > { %v153_v9 = vrot.slane (!%p113_p2), %v148_v2, %v152_v4  ;;  %v157_v10 = vrot.slane (!%p113_p2), %v148_v2, %v156_v5  ;;  %v170_v11 = vrot.slane (!%p113_p2), %v253_v3, %v152_v4  ;;  %v174_v12 = vrot.slane (!%p113_p2), %v253_v3, %v156_v5 }
   0xd   : > { %s316_s10 = smov (!%p134_p3, %s244_s10), 1 }
   0xe   : > { %s256_s15 = sshll.u32 %s316_s10, 5 }
   0xf   : > { %s138_s18 = scalar_lea.vmem %s312_s0, %s256_s15  ;;  %s143_s21 = scalar_lea.vmem %s314_s2, %s256_s15 }
  0x10   : > { %v144_v6 = vld [vmem:[%s138_s18] sm:$0xff]  ;;  %v145_v7 = vld [vmem:[%s138_s18 + $0x8] sm:$0xff]  ;;  %v146_v8 = vld [vmem:[%s138_s18 + $0x10] sm:$0xff] }
  0x11   : > { %v147_v13 = vld [vmem:[%s138_s18 + $0x18] sm:$0xff]  ;;  %v160_v14 = vmul.f32 %v153_v9, %v144_v6  ;;  %v161_v15 = vmul.f32 %v157_v10, %v145_v7  ;;  %v162_v16 = vmul.f32 %v153_v9, %v146_v8 }
  0x12   : > { %v163_v17 = vmul.f32 %v157_v10, %v147_v13 }
  0x13   : > { %v177_v18 = vadd.f32 %v170_v11, %v160_v14  ;;  %v178_v19 = vadd.f32 %v174_v12, %v161_v15  ;;  %v179_v20 = vadd.f32 %v170_v11, %v162_v16 }
  0x14   : > { %v180_v21 = vadd.f32 %v174_v12, %v163_v17 }
  0x15   : > { %v181_v22 = vmax.f32 %v177_v18, 0.0  ;;  %v182_v23 = vmax.f32 %v178_v19, 0.0  ;;  %v183_v24 = vmax.f32 %v179_v20, 0.0 }
  0x16   : > { %v184_v25 = vmax.f32 %v180_v21, 0.0 }
  0x17   : > { %185 = vst [vmem:[%s143_s21] sm:$0xff] %v181_v22  ;;  %186 = vst [vmem:[%s143_s21 + $0x8] sm:$0xff] %v182_v23 }
  0x18   : > { %187 = vst [vmem:[%s143_s21 + $0x10] sm:$0xff] %v183_v24  ;;  %188 = vst [vmem:[%s143_s21 + $0x18] sm:$0xff] %v184_v25 }
  0x19 PF: > { %s12_s9 = sadd.s32 1, %s272_s9  }
  0x1a   : > { %p9_p4 = scmp.ge.s32.totalorder %s12_s9, 4  }
  0x1c   :  { %11 = sbr.rel (!%p9_p4) target bundleno = 1 (0x1), region = 59 }

</bundles_post_ra>
